<compile_context>
chip_gen: v5e
topology: v5e:2x2
jax: 0.10.0
libtpu: 0.0.40
codegen_flags: <defaults>
</compile_context>

<pallas_src>
import jax
import jax.numpy as jnp
from jax.experimental import pallas as pl
from jax.experimental.pallas import tpu as pltpu

LANE = 128


def linear_kernel(x_ref, wb_ref, o_ref):
    # x_ref:  (2, R, 128)  input dtype, VMEM (batch sublane+lane dense)
    # wb_ref: (3,)         f32 SMEM: [w0, w1, b]
    # o_ref:  (R, 128)     f32 VMEM
    w0 = wb_ref[0]
    w1 = wb_ref[1]
    b = wb_ref[2]
    x0 = x_ref[0].astype(jnp.float32)   # (R, 128)
    x1 = x_ref[1].astype(jnp.float32)   # (R, 128)
    # Pure VPU elementwise FMA with scalar broadcast over sublanes/lanes.
    o_ref[...] = x0 * w0 + x1 * w1 + b


def linear_forward(x, weight, bias, *, max_rows_per_block=4096, target_grid_steps=4):
    """PyTorch nn.Linear(2, 1): y = x @ weight.T + bias.

    x: (B, 2), weight: (1, 2), bias: (1,) -> returns (B, 1).
    """
    B, IN = x.shape
    OUT, IN_w = weight.shape
    assert IN == 2 and IN_w == 2 and OUT == 1

    # ---- Layout: (2, rows, 128), rows = ceil(B/128). Pad ONLY to 128 lanes.
    b_pad = pl.cdiv(B, LANE) * LANE
    rows = b_pad // LANE

    xt = jnp.transpose(x)                         # (2, B), native dtype
    if b_pad != B:
        xt = jnp.pad(xt, ((0, 0), (0, b_pad - B)))
    xt = xt.reshape(IN, rows, LANE)               # free reshape of contiguous (2, b_pad)

    # Sublane multiple required by the input dtype's packing (f32:8, bf16:16, int8/fp8:32).
    itemsize = jnp.dtype(x.dtype).itemsize
    sub = {4: 8, 2: 16, 1: 32}.get(itemsize, 8)

    # Rows per block: MiB-scale tiles (amortize ~0.35us/step), but keep
    # >= target_grid_steps steps so both v7x TensorCores get work.
    r = pl.cdiv(rows, target_grid_steps)
    r = pl.cdiv(r, sub) * sub
    r = max(sub, min(max_rows_per_block, r))
    grid = (pl.cdiv(rows, r),)

    # Pack weight + bias into a single SMEM scalar vector [w0, w1, b].
    wb = jnp.concatenate(
        [weight.reshape(IN * OUT), bias.reshape(OUT)]
    ).astype(jnp.float32)                         # (3,)

    out = pl.pallas_call(
        linear_kernel,
        out_shape=jax.ShapeDtypeStruct((rows, LANE), jnp.float32),
        grid_spec=pltpu.PrefetchScalarGridSpec(
            num_scalar_prefetch=0,
            grid=grid,
            in_specs=[
                pl.BlockSpec((IN, r, LANE), lambda i: (0, i, 0)),
                pl.BlockSpec(memory_space=pltpu.MemorySpace.SMEM),
            ],
            out_specs=pl.BlockSpec((r, LANE), lambda i: (i, 0)),
        ),
        compiler_params=pltpu.CompilerParams(
            dimension_semantics=("parallel",),
            vmem_limit_bytes=48 * 1024 * 1024,
        ),
        cost_estimate=pl.CostEstimate(
            flops=3 * B,
            transcendentals=0,
            bytes_accessed=(2 * itemsize + 4) * B,
        ),
    )(xt, wb)

    # Drop padded lanes (no-op when B is already a multiple of 128) and
    # return the PyTorch layout (B, 1) in the input dtype.
    y = out.reshape(b_pad)[:B].reshape(B, OUT)
    return y.astype(x.dtype)


if __name__ == "__main__":
    key = jax.random.PRNGKey(0)
    kx, kw, kb = jax.random.split(key, 3)

    # Deterministic "parameters" for nn.Linear(2, 1)
    weight = jax.random.normal(kw, (1, 2), dtype=jnp.float32) * 0.5
    bias = jax.random.normal(kb, (1,), dtype=jnp.float32) * 0.1

    # Input: batch=8, in_features=2
    x = jax.random.normal(kx, (8, 2), dtype=jnp.float32)

    fwd = jax.jit(linear_forward)
    out = jax.block_until_ready(fwd(x, weight, bias))

    # Reference check against plain JAX
    ref = x @ weight.T + bias
    assert out.shape == (8, 1)
    assert jnp.allclose(out, ref, atol=1e-5, rtol=1e-5), "mismatch vs reference"

    print("KERNEL_OK")
</pallas_src>

<mosaic_0001>
module attributes {stable_mosaic.version = 11 : i64} {
  func.func @linear_kernel(%arg0: i32, %arg1: memref<2x8x128xf32, #tpu.memory_space<vmem>>, %arg2: memref<3xf32, #tpu.memory_space<smem>>, %arg3: memref<8x128xf32, #tpu.memory_space<vmem>>) attributes {dimension_semantics = [#tpu.dimension_semantics<parallel>], iteration_bounds = array<i64: 1>, scalar_prefetch = 0 : i64, scratch_operands = 0 : i64, tpu.core_type = #tpu.core_type<tc>, window_params = [{transform_indices = @transform_0, window_bounds = array<i64: 2, 8, 128>}, {transform_indices = @transform_1, window_bounds = array<i64: 3>}, {transform_indices = @transform_2, window_bounds = array<i64: 8, 128>}]} {
    %c0 = arith.constant 0 : index
    %0 = memref.load %arg2[%c0] : memref<3xf32, #tpu.memory_space<smem>>
    %c1 = arith.constant 1 : index
    %1 = memref.load %arg2[%c1] : memref<3xf32, #tpu.memory_space<smem>>
    %c2 = arith.constant 2 : index
    %2 = memref.load %arg2[%c2] : memref<3xf32, #tpu.memory_space<smem>>
    %c0_0 = arith.constant 0 : index
    %c0_1 = arith.constant 0 : index
    %c0_2 = arith.constant 0 : index
    %3 = vector.load %arg1[%c0_0, %c0_1, %c0_2] : memref<2x8x128xf32, #tpu.memory_space<vmem>>, vector<1x8x128xf32>
    %4 = vector.shape_cast %3 : vector<1x8x128xf32> to vector<8x128xf32>
    %c1_3 = arith.constant 1 : index
    %c0_4 = arith.constant 0 : index
    %c0_5 = arith.constant 0 : index
    %5 = vector.load %arg1[%c1_3, %c0_4, %c0_5] : memref<2x8x128xf32, #tpu.memory_space<vmem>>, vector<1x8x128xf32>
    %6 = vector.shape_cast %5 : vector<1x8x128xf32> to vector<8x128xf32>
    %7 = vector.broadcast %0 : f32 to vector<8x128xf32>
    %8 = arith.mulf %4, %7 : vector<8x128xf32>
    %9 = vector.broadcast %1 : f32 to vector<8x128xf32>
    %10 = arith.mulf %6, %9 : vector<8x128xf32>
    %11 = arith.addf %8, %10 : vector<8x128xf32>
    %12 = vector.broadcast %2 : f32 to vector<8x128xf32>
    %13 = arith.addf %11, %12 : vector<8x128xf32>
    %c0_6 = arith.constant 0 : index
    %c0_7 = arith.constant 0 : index
    %14 = vector.load %arg3[%c0_6, %c0_7] : memref<8x128xf32, #tpu.memory_space<vmem>>, vector<8x128xf32>
    tpu.vector_store %arg3[%c0_6, %c0_7], %13 {strides = array<i32>} : memref<8x128xf32, #tpu.memory_space<vmem>>, vector<8x128xf32>,
    return
  }
  func.func @transform_0(%arg0: i32) -> (i32, i32, i32) {
    %c0_i32 = arith.constant 0 : i32
    %c0_i32_0 = arith.constant 0 : i32
    %c0_i32_1 = arith.constant 0 : i32
    return %c0_i32, %arg0, %c0_i32_0 : i32, i32, i32
  }
  func.func @transform_1(%arg0: i32) -> i32 {
    %c0_i32 = arith.constant 0 : i32
    %c0_i32_0 = arith.constant 0 : i32
    return %c0_i32 : i32
  }
  func.func @transform_2(%arg0: i32) -> (i32, i32) {
    %c0_i32 = arith.constant 0 : i32
    %c0_i32_0 = arith.constant 0 : i32
    return %arg0, %c0_i32 : i32, i32
  }
}

</mosaic_0001>

<bundles_post_ra>
// kernel: linear_forward.1
= control target key start
LH: loop header
LB: loop body
LE: loop exit
PB: predicated region body
PF: predicated region fallthrough
CT: control target
= control target key end

     0   :  { %s168_s0 = inlined_call_operand.vmem [shape: f32[2,1,128], index: 0, kind: input, shape index: {}]   ;;  %s169_s1 = inlined_call_operand.vmem [shape: f32[3], index: 1, kind: input, shape index: {}]   ;;  %s170_s2 = inlined_call_operand.vmem [shape: f32[1,128], index: 2, kind: output, shape index: {}]  }
   0x1   :  { %v26_v0 = vld [vmem:[%s168_s0] sm:$0x1]  ;;  %v28_v1 = vld [vmem:[%s168_s0 + $0x1] sm:$0x1] }
   0x2   :  { %7 = vsyncpa [#allocation4], 0  ;;  %27 = vst [vmem:[#allocation2] sm:$0x1] %v26_v0  ;;  %s52_s15 = sshll.u32 %s169_s1, 4  ;;  %s140_s16 = smov [#allocation3]   ;;  %s53_s15 = int_to_ptr.vmem [resolvable:$true] %s52_s15 }
   0x3   :  { %29 = vst [vmem:[#allocation2 + $0x8] sm:$0x1] %v28_v1  ;;  %55 = dma.vmem_to_smem %s53_s15, 16, %s140_s16, [#allocation4]  }
   0x4   :  { %138 = dma.done.wait [#allocation4], 16  }
   0x5   :  { %139 = vsyncadd [#allocation4], 4294967280 }
   0x6   :  { %62 = sfence }
   0x7   :  { %s63_s17 = sld [smem:[#allocation3]] }
   0x8   :  { %s123_s18 = sld [smem:[#allocation3 + $0x1]] }
   0x9   :  { %s124_s19 = sld [smem:[#allocation3 + $0x2]]  ;;  %v66_v2 = vld [vmem:[#allocation2] sm:$0xff] }
   0xa   :  { %v68_v3 = vld [vmem:[#allocation2 + $0x8] sm:$0xff] }
   0xd   :  { %v69_v4 = vstv %s63_s17 }
   0xe   :  { %v70_v5 = vmul.f32 %v69_v4, %v66_v2  ;;  %v71_v6 = vstv %s123_s18 }
   0xf   :  { %v72_v7 = vmul.f32 %v71_v6, %v68_v3  ;;  %v74_v8 = vstv %s124_s19 }
  0x11   :  { %v73_v9 = vadd.f32 %v72_v7, %v70_v5 }
  0x13   :  { %v75_v10 = vadd.f32 %v74_v8, %v73_v9 }
  0x15   :  { %76 = vst [vmem:[#allocation5] sm:$0xff] %v75_v10 }
  0x1c   :  { %v95_v11 = vld [vmem:[#allocation5] sm:$0x1] }
  0x1d   :  { %96 = vst [vmem:[%s170_s2] sm:$0x1] %v95_v11 }
  0x1e   :  { %114 = vsyncpa [#allocation4], 1 }

</bundles_post_ra>
